<compile_context>
chip_gen: v7x
topology: tpu7x:2x2x1
jax: 0.10.0
libtpu: 0.0.40
codegen_flags: <defaults>
</compile_context>

<pallas_src>
import jax
import jax.numpy as jnp
from jax import lax
from jax.experimental import pallas as pl
from jax.experimental.pallas import tpu as pltpu


def _round_up(x, m):
    return ((x + m - 1) // m) * m


def _linear_kernel_acc(x_ref, w_ref, b_ref, o_ref, acc_ref):
    # x_ref: [tm, tk], w_ref: [tn, tk] (original nn.Linear layout),
    # b_ref: [1, tn], o_ref: [tm, tn], acc_ref: [tm, tn] f32 scratch.
    k = pl.program_id(2)

    @pl.when(k == 0)
    def _():
        acc_ref[...] = jnp.zeros_like(acc_ref)

    # Contract x's last dim with w's last dim (== x @ W.T) on the MXU.
    acc_ref[...] += lax.dot_general(
        x_ref[...], w_ref[...],
        dimension_numbers=(((1,), (1,)), ((), ())),
        preferred_element_type=jnp.float32)

    @pl.when(k == pl.num_programs(2) - 1)
    def _():
        o_ref[...] = (acc_ref[...] + b_ref[...].astype(jnp.float32)).astype(o_ref.dtype)


def _linear_kernel_single_k(x_ref, w_ref, b_ref, o_ref):
    # Entire contraction dim resident in one tile: write the result directly.
    acc = lax.dot_general(
        x_ref[...], w_ref[...],
        dimension_numbers=(((1,), (1,)), ((), ())),
        preferred_element_type=jnp.float32)
    o_ref[...] = (acc + b_ref[...].astype(jnp.float32)).astype(o_ref.dtype)


def decoder_forward(x, weight, bias, *, tm=256, tn=256, tk=512):
    """x: [..., emb_dim]; weight: [out_channels, emb_dim]; bias: [out_channels]."""
    *lead, emb_dim = x.shape
    out_channels = weight.shape[0]
    m = 1
    for d in lead:
        m *= d

    x2d = x.reshape(m, emb_dim)

    # Effective tile sizes: never larger than the (hardware-aligned) padded dims.
    tm_eff = min(tm, _round_up(m, 8))               # sublane-aligned
    tn_eff = min(tn, _round_up(out_channels, 128))  # lane-dense output tiles
    tk_eff = min(tk, _round_up(emb_dim, 128))

    m_pad = _round_up(m, tm_eff)
    n_pad = _round_up(out_channels, tn_eff)
    k_pad = _round_up(emb_dim, tk_eff)

    # Zero-pad ragged dims (padded output rows/cols are sliced off below).
    if (m_pad, k_pad) != (m, emb_dim):
        x2d = jnp.pad(x2d, ((0, m_pad - m), (0, k_pad - emb_dim)))
    w_p = weight
    if (n_pad, k_pad) != (out_channels, emb_dim):
        w_p = jnp.pad(weight, ((0, n_pad - out_channels), (0, k_pad - emb_dim)))
    b_p = bias
    if n_pad != out_channels:
        b_p = jnp.pad(bias, (0, n_pad - out_channels))
    b2d = b_p.reshape(1, n_pad)

    n_k_tiles = k_pad // tk_eff

    itemsize = jnp.dtype(x.dtype).itemsize
    cost = pl.CostEstimate(
        flops=2 * m_pad * n_pad * k_pad,
        transcendentals=0,
        bytes_accessed=(m_pad * k_pad * itemsize          # x
                        + n_pad * k_pad * itemsize        # weight
                        + n_pad * itemsize                # bias
                        + m_pad * n_pad * itemsize),      # output
    )

    if n_k_tiles == 1:
        # Fast path: single K tile -> 2-D grid, no accumulator scratch.
        grid_spec = pltpu.PrefetchScalarGridSpec(
            num_scalar_prefetch=0,
            grid=(m_pad // tm_eff, n_pad // tn_eff),
            in_specs=[
                pl.BlockSpec((tm_eff, tk_eff), lambda i, j: (i, 0)),   # x
                pl.BlockSpec((tn_eff, tk_eff), lambda i, j: (j, 0)),   # weight (no transpose)
                pl.BlockSpec((1, tn_eff), lambda i, j: (0, j)),        # bias
            ],
            out_specs=pl.BlockSpec((tm_eff, tn_eff), lambda i, j: (i, j)),
        )
        kernel = _linear_kernel_single_k
        dim_sem = ("parallel", "parallel")
    else:
        grid_spec = pltpu.PrefetchScalarGridSpec(
            num_scalar_prefetch=0,
            grid=(m_pad // tm_eff, n_pad // tn_eff, n_k_tiles),
            in_specs=[
                pl.BlockSpec((tm_eff, tk_eff), lambda i, j, k: (i, k)),   # x
                pl.BlockSpec((tn_eff, tk_eff), lambda i, j, k: (j, k)),   # weight (no transpose)
                pl.BlockSpec((1, tn_eff), lambda i, j, k: (0, j)),        # bias
            ],
            out_specs=pl.BlockSpec((tm_eff, tn_eff), lambda i, j, k: (i, j)),
            scratch_shapes=[pltpu.VMEM((tm_eff, tn_eff), jnp.float32)],
        )
        kernel = _linear_kernel_acc
        dim_sem = ("parallel", "parallel", "arbitrary")

    out2d = pl.pallas_call(
        kernel,
        out_shape=jax.ShapeDtypeStruct((m_pad, n_pad), x.dtype),
        grid_spec=grid_spec,
        compiler_params=pltpu.CompilerParams(dimension_semantics=dim_sem),
        cost_estimate=cost,
    )(x2d, w_p, b2d)

    out2d = out2d[:m, :out_channels]
    return out2d.reshape(*lead, out_channels)


if __name__ == "__main__":
    # Small shapes consistent with the module: batch=2, seq=8, emb_dim=32,
    # out_channels=16.
    batch, seq, emb_dim, out_channels = 2, 8, 32, 16

    key = jax.random.PRNGKey(0)
    kx, kw, kb = jax.random.split(key, 3)

    x = jax.random.normal(kx, (batch, seq, emb_dim), dtype=jnp.float32)
    # Deterministic parameter init (matches nn.Linear param shapes).
    bound = 1.0 / (emb_dim ** 0.5)
    weight = jax.random.uniform(
        kw, (out_channels, emb_dim), minval=-bound, maxval=bound,
        dtype=jnp.float32)
    bias = jax.random.uniform(
        kb, (out_channels,), minval=-bound, maxval=bound, dtype=jnp.float32)

    y = decoder_forward(x, weight, bias)
    y = jax.block_until_ready(y)

    # Reference check against plain JAX (same math as PyTorch nn.Linear).
    y_ref = x @ weight.T + bias
    assert y.shape == (batch, seq, out_channels)
    assert jnp.allclose(y, y_ref, atol=1e-5, rtol=1e-5)

    print("KERNEL_OK")
</pallas_src>

<mosaic_0001>
module attributes {stable_mosaic.version = 11 : i64} {
  func.func @_linear_kernel_single_k(%arg0: i32, %arg1: i32, %arg2: memref<16x128xf32, #tpu.memory_space<vmem>>, %arg3: memref<128x128xf32, #tpu.memory_space<vmem>>, %arg4: memref<1x128xf32, #tpu.memory_space<vmem>>, %arg5: memref<16x128xf32, #tpu.memory_space<vmem>>) attributes {dimension_semantics = [#tpu.dimension_semantics<parallel>, #tpu.dimension_semantics<parallel>], iteration_bounds = array<i64: 1, 1>, scalar_prefetch = 0 : i64, scratch_operands = 0 : i64, tpu.core_type = #tpu.core_type<tc>, window_params = [{transform_indices = @transform_0, window_bounds = array<i64: 16, 128>}, {transform_indices = @transform_1, window_bounds = array<i64: 128, 128>}, {transform_indices = @transform_2, window_bounds = array<i64: 1, 128>}, {transform_indices = @transform_3, window_bounds = array<i64: 16, 128>}]} {
    %c0 = arith.constant 0 : index
    %c0_0 = arith.constant 0 : index
    %0 = vector.load %arg2[%c0, %c0_0] : memref<16x128xf32, #tpu.memory_space<vmem>>, vector<16x128xf32>
    %c0_1 = arith.constant 0 : index
    %c0_2 = arith.constant 0 : index
    %1 = vector.load %arg3[%c0_1, %c0_2] : memref<128x128xf32, #tpu.memory_space<vmem>>, vector<128x128xf32>
    %cst = arith.constant dense<0.000000e+00> : vector<16x128xf32>
    %2 = tpu.matmul %0, %1, %cst {dimension_numbers = #tpu.dot_dimension_numbers<[1], [1], [0], [0], [0, 0, 1, 0], [], []>} : vector<16x128xf32>, vector<128x128xf32>, vector<16x128xf32> -> vector<16x128xf32>
    %c0_3 = arith.constant 0 : index
    %c0_4 = arith.constant 0 : index
    %3 = vector.load %arg4[%c0_3, %c0_4] : memref<1x128xf32, #tpu.memory_space<vmem>>, vector<1x128xf32>
    %4 = vector.broadcast %3 : vector<1x128xf32> to vector<16x128xf32>
    %5 = arith.addf %2, %4 : vector<16x128xf32>
    %c0_5 = arith.constant 0 : index
    %c0_6 = arith.constant 0 : index
    %6 = vector.load %arg5[%c0_5, %c0_6] : memref<16x128xf32, #tpu.memory_space<vmem>>, vector<16x128xf32>
    tpu.vector_store %arg5[%c0_5, %c0_6], %5 {strides = array<i32>} : memref<16x128xf32, #tpu.memory_space<vmem>>, vector<16x128xf32>,
    return
  }
  func.func @transform_0(%arg0: i32, %arg1: i32) -> (i32, i32) {
    %c0_i32 = arith.constant 0 : i32
    %c0_i32_0 = arith.constant 0 : i32
    return %arg0, %c0_i32 : i32, i32
  }
  func.func @transform_1(%arg0: i32, %arg1: i32) -> (i32, i32) {
    %c0_i32 = arith.constant 0 : i32
    %c0_i32_0 = arith.constant 0 : i32
    return %arg1, %c0_i32 : i32, i32
  }
  func.func @transform_2(%arg0: i32, %arg1: i32) -> (i32, i32) {
    %c0_i32 = arith.constant 0 : i32
    %c0_i32_0 = arith.constant 0 : i32
    return %c0_i32, %arg1 : i32, i32
  }
  func.func @transform_3(%arg0: i32, %arg1: i32) -> (i32, i32) {
    %c0_i32 = arith.constant 0 : i32
    return %arg0, %arg1 : i32, i32
  }
}

</mosaic_0001>

<bundles_post_ra>
// kernel: tpu_custom_call.1
= control target key start
LH: loop header
LB: loop body
LE: loop exit
PB: predicated region body
PF: predicated region fallthrough
CT: control target
= control target key end

     0   :  { %8 = vsyncpa [#allocation3], 0  ;;  %s399_s0 = inlined_call_operand.hbm [shape: f32[16,128], index: 0, kind: input, shape index: {}]   ;;  %s400_s1 = inlined_call_operand.hbm [shape: f32[128,128], index: 1, kind: input, shape index: {}]   ;;  %s401_s2 = inlined_call_operand.vmem [shape: f32[1,128], index: 2, kind: input, shape index: {}]   ;;  %s402_s3 = inlined_call_operand.hbm [shape: f32[16,128], index: 3, kind: output, shape index: {}]  }
   0x1   :  { %9 = vsyncpa [#allocation6], 0 }
   0x2   :  { %10 = vsyncpa [#allocation4], 0  ;;  %s326_s12 = smov [#allocation2]   ;;  %s254_s16 = scalar_lea.hbm %s399_s0, 256 }
   0x3   :  { %s16_s13 = sshll.u32 %s326_s12, 4  ;;  %p255_p0 = scmp.ne.s32.totalorder %s399_s0, %s254_s16  ;;  %s17_s13 = int_to_ptr.vmem [resolvable:$true] %s16_s13 }
   0x4   :  { %p258_p1 = scmp.lt.u32.totalorder %s254_s16, %s399_s0 }
   0x6   :  { %p260_p2 = pnand %p258_p1, %p255_p0 }
   0x8   :  { %263 = shalt.err (!%p260_p2)
}
   0x9   :  { %s264_s21 = scalar_lea.vmem %s17_s13, 256  ;;  %p269_p4 = scmp.lt.s32.totalorder %s17_s13, %s17_s13 }
   0xa   :  { %p265_p3 = scmp.ne.s32.totalorder %s17_s13, %s264_s21  ;;  %p270_p5 = scmp.lt.s32.totalorder %s264_s21, %s264_s21 }
   0xc   :  { %p271_p6 = por %p270_p5, %p269_p4 }
   0xe   :  { %p272_p7 = pnand %p271_p6, %p265_p3 }
  0x10   :  { %275 = shalt.err (!%p272_p7)
}
  0x11   :  { %s327_s22 = smov 128   ;;  %s328_s23 = smov 8  }
  0x12   :  { %22 = dma.hbm_to_vmem [thread:$0]  %s399_s0, 256, %s17_s13, [#allocation3], %s327_s22, %s327_s22, %s328_s23  }
  0x13   :  { %s329_s26 = smov [#allocation5]   ;;  %s276_s30 = scalar_lea.hbm %s400_s1, 2048 }
  0x14   :  { %s28_s27 = sshll.u32 %s329_s26, 4  ;;  %p277_p8 = scmp.ne.s32.totalorder %s400_s1, %s276_s30  ;;  %s29_s27 = int_to_ptr.vmem [resolvable:$true] %s28_s27 }
  0x15   :  { %p280_p9 = scmp.lt.u32.totalorder %s276_s30, %s400_s1 }
  0x17   :  { %p282_p10 = pnand %p280_p9, %p277_p8 }
  0x19   :  { %285 = shalt.err (!%p282_p10)
}
  0x1a   :  { %s286_s8 = scalar_lea.vmem %s29_s27, 2048  ;;  %p291_p12 = scmp.lt.s32.totalorder %s29_s27, %s29_s27 }
  0x1b   :  { %p287_p11 = scmp.ne.s32.totalorder %s29_s27, %s286_s8  ;;  %p292_p13 = scmp.lt.s32.totalorder %s286_s8, %s286_s8 }
  0x1d   :  { %p293_p0 = por %p292_p13, %p291_p12 }
  0x1f   :  { %p294_p1 = pnand %p293_p0, %p287_p11 }
  0x21   :  { %297 = shalt.err (!%p294_p1)
}
  0x22   :  { %34 = dma.hbm_to_vmem [thread:$0]  %s400_s1, 2048, %s29_s27, [#allocation6], %s327_s22, %s327_s22, %s328_s23  }
  0x23   :  { %320 = dma.done.wait [#allocation3], 256  }
  0x24   :  { %321 = vsyncadd [#allocation3], 4294967040 }
  0x25   :  { %322 = dma.done.wait [#allocation6], 2048  }
  0x26   :  { %323 = vsyncadd [#allocation6], 4294965248  ;;  %v45_v0 = vld [vmem:[#allocation5] sm:$0xff]  ;;  %v46_v1 = vld [vmem:[#allocation5 + $0x8] sm:$0xff]  ;;  %s330_s11 = smov [#allocation7]  }
  0x27   :  { %v47_v2 = vld [vmem:[#allocation5 + $0x10] sm:$0xff]  ;;  %v217_v3 = vpack.c.bf16 %v46_v1, %v45_v0  ;;  %v48_v4 = vld [vmem:[#allocation5 + $0x18] sm:$0xff]  ;;  %v49_v7 = vld [vmem:[#allocation5 + $0x20] sm:$0xff]  ;;  %s150_s12 = sshll.u32 %s330_s11, 4  ;;  %s151_s12 = int_to_ptr.vmem [resolvable:$true] %s150_s12 }
  0x28   :  { %v221_v5 = vpack.c.bf16 %v48_v4, %v47_v2  ;;  %v43_v6 = vld [vmem:[#allocation2] sm:$0xff]  ;;  %v50_v8 = vld [vmem:[#allocation5 + $0x28] sm:$0xff]  ;;  %v52_v11 = vld [vmem:[#allocation5 + $0x38] sm:$0xff]  ;;  %s298_s13 = scalar_lea.vmem %s151_s12, 256  ;;  %p303_p3 = scmp.lt.s32.totalorder %s151_s12, %s151_s12 }
  0x29   :  { %218 = vmatprep.subr.bf16.mxu0 %v217_v3  ;;  %214 = vmatprep.mubr.f32.mxu0 %v43_v6  ;;  %v225_v9 = vpack.c.bf16 %v50_v8, %v49_v7  ;;  %v51_v10 = vld [vmem:[#allocation5 + $0x30] sm:$0xff]  ;;  %v53_v13 = vld [vmem:[#allocation5 + $0x40] sm:$0xff]  ;;  %v54_v14 = vld [vmem:[#allocation5 + $0x48] sm:$0xff]  ;;  %p299_p2 = scmp.ne.s32.totalorder %s151_s12, %s298_s13  ;;  %p304_p4 = scmp.lt.s32.totalorder %s298_s13, %s298_s13 }
  0x2a   :  { %220 = vmatpush3.bf16.xpose.msra.mxu0 %v217_v3  ;;  %v229_v12 = vpack.c.bf16 %v52_v11, %v51_v10  ;;  %v233_v15 = vpack.c.bf16 %v54_v14, %v53_v13  ;;  %v55_v16 = vld [vmem:[#allocation5 + $0x50] sm:$0xff]  ;;  %v56_v17 = vld [vmem:[#allocation5 + $0x58] sm:$0xff]  ;;  %v57_v19 = vld [vmem:[#allocation5 + $0x60] sm:$0xff] }
  0x2b   :  { %222 = vmatprep.subr.bf16.mxu0 %v221_v5  ;;  %v237_v18 = vpack.c.bf16 %v56_v17, %v55_v16  ;;  %v58_v20 = vld [vmem:[#allocation5 + $0x68] sm:$0xff]  ;;  %v59_v22 = vld [vmem:[#allocation5 + $0x70] sm:$0xff]  ;;  %v60_v23 = vld [vmem:[#allocation5 + $0x78] sm:$0xff]  ;;  %p305_p5 = por %p304_p4, %p303_p3 }
  0x2c   :  { %v241_v21 = vpack.c.bf16 %v58_v20, %v57_v19  ;;  %v245_v24 = vpack.c.bf16 %v60_v23, %v59_v22  ;;  %v44_v25 = vld [vmem:[#allocation2 + $0x8] sm:$0xff]  ;;  %v163_v26 = vld [vmem:[%s401_s2] ss:$0 sm:$0xff] }
  0x2d   :  { %p306_p6 = pnand %p305_p5, %p299_p2 }
  0x32   :  { %224 = vmatpush3.bf16.xpose.msra.mxu0 %v221_v5 }
  0x33   :  { %226 = vmatprep.subr.bf16.mxu0 %v225_v9 }
  0x3a   :  { %228 = vmatpush3.bf16.xpose.msra.mxu0 %v225_v9 }
  0x3b   :  { %230 = vmatprep.subr.bf16.mxu0 %v229_v12 }
  0x42   :  { %232 = vmatpush3.bf16.xpose.msra.mxu0 %v229_v12 }
  0x43   :  { %234 = vmatprep.subr.bf16.mxu0 %v233_v15 }
  0x4a   :  { %236 = vmatpush3.bf16.xpose.msra.mxu0 %v233_v15 }
  0x4b   :  { %238 = vmatprep.subr.bf16.mxu0 %v237_v18 }
  0x52   :  { %240 = vmatpush3.bf16.xpose.msra.mxu0 %v237_v18 }
  0x53   :  { %242 = vmatprep.subr.bf16.mxu0 %v241_v21 }
  0x5a   :  { %244 = vmatpush3.bf16.xpose.msra.mxu0 %v241_v21 }
  0x5b   :  { %246 = vmatprep.subr.bf16.mxu0 %v245_v24 }
  0x62   :  { %248 = vmatpush3.bf16.xpose.msra.mxu0 %v245_v24 }
  0x69   :  { %215 = vmatmul.mubr.f32.vlgmr.msra.gmra.mrb[0].mxu0 %v44_v25 }
 0x13c   :  { %v216_v27 = vpop.f32.mrb[0].mxu0 }
 0x13d   :  { %v140_v28 = vadd.f32 %v216_v27, %v163_v26  ;;  %v134_v29 = vpop.f32.mrb[1].mxu0 }
 0x13e   :  { %v135_v30 = vadd.f32 %v163_v26, %v134_v29 }
 0x13f   :  { %144 = vst [vmem:[#allocation7 + $0x8] sm:$0xff] %v140_v28 }
 0x140   :  { %143 = vst [vmem:[#allocation7] sm:$0xff] %v135_v30 }
 0x141   :  { %309 = shalt.err (!%p306_p6)
}
 0x142   :  { %s310_s2 = scalar_lea.hbm %s402_s3, 256 }
 0x143   :  { %p311_p7 = scmp.ne.s32.totalorder %s402_s3, %s310_s2  ;;  %p314_p8 = scmp.lt.u32.totalorder %s310_s2, %s402_s3 }
 0x145   :  { %p316_p9 = pnand %p314_p8, %p311_p7 }
 0x147   :  { %319 = shalt.err (!%p316_p9)
}
 0x148   :  { %156 = dma.vmem_to_hbm [thread:$0]  %s151_s12, 256, %s402_s3, [#allocation4], %s327_s22, %s327_s22, %s328_s23  }
 0x149   :  { %324 = dma.done.wait [#allocation4], 256  }
 0x14a   :  { %325 = vsyncadd [#allocation4], 4294967040 }
 0x14b   :  { %160 = vsyncpa [#allocation3], 1 }
 0x14c   :  { %161 = vsyncpa [#allocation6], 1 }
 0x14d   :  { %162 = vsyncpa [#allocation4], 1 }

</bundles_post_ra>
